<compile_context>
chip_gen: v6e
topology: v6e:2x2x1
jax: 0.10.0
libtpu: 0.0.40
codegen_flags: <defaults>
</compile_context>

<pallas_src>
import jax
import jax.numpy as jnp
from jax.experimental import pallas as pl
from jax.experimental.pallas import tpu as pltpu


def _round_up(x, m):
    return ((x + m - 1) // m) * m


def _cdiv(a, b):
    return (a + b - 1) // b


def ppo_policy_kernel(obs_ref, w1_ref, b1_ref, w2_ref, b2_ref,
                      w3_ref, b3_ref, mean_ref):
    # f32 -> bf16 cast in-kernel (VPU, hidden under the DMA/matmul).
    x = obs_ref[...].astype(w1_ref.dtype)
    # hidden layer 1: tanh(obs @ W1 + b1)  (bf16 MXU matmul, f32 accum, f32 tanh)
    h1 = jnp.tanh(
        jnp.dot(x, w1_ref[...], preferred_element_type=jnp.float32)
        + b1_ref[...]
    )
    # hidden layer 2: tanh(h1 @ W2 + b2)
    h2 = jnp.tanh(
        jnp.dot(h1.astype(w2_ref.dtype), w2_ref[...],
                preferred_element_type=jnp.float32)
        + b2_ref[...]
    )
    # mean head: h2 @ W3 + b3  (output block is (TB, ac_dim) f32, unpadded)
    mean = (
        jnp.dot(h2.astype(w3_ref.dtype), w3_ref[...],
                preferred_element_type=jnp.float32)
        + b3_ref[...]
    )
    mean_ref[...] = mean.astype(mean_ref.dtype)


def prepare_params(params, compute_dtype=jnp.bfloat16):
    """One-time parameter prep (hoisted out of the per-forward hot path):
    bf16 cast + 128-lane padding of the *hidden* dim only. The contraction dim
    of W1 stays at obs_dim (matches the unpadded obs) and the output dim of W3
    stays at ac_dim (matches the unpadded mean output block)."""
    w1, b1, w2, b2, w3, b3, log_std = params
    obs_dim, hidden = w1.shape
    ac_dim = w3.shape[1]
    Hp = _round_up(hidden, 128)

    def pad2(x, r, c, dtype):
        out = jnp.zeros((r, c), dtype)
        return out.at[: x.shape[0], : x.shape[1]].set(x.astype(dtype))

    w1_p = pad2(w1, obs_dim, Hp, compute_dtype)          # (obs_dim, Hp)
    w2_p = pad2(w2, Hp, Hp, compute_dtype)               # (Hp, Hp)
    w3_p = pad2(w3, Hp, ac_dim, compute_dtype)           # (Hp, ac_dim)
    b1_p = pad2(b1.reshape(1, -1), 1, Hp, jnp.float32)   # (1, Hp)
    b2_p = pad2(b2.reshape(1, -1), 1, Hp, jnp.float32)   # (1, Hp)
    b3_p = b3.reshape(1, -1).astype(jnp.float32)         # (1, ac_dim)
    # std is batch-independent: compute once here, never broadcast to (B, .).
    std = jnp.exp(log_std.astype(jnp.float32)).reshape(1, -1)
    return (w1_p, b1_p, w2_p, b2_p, w3_p, b3_p, std)


def _choose_tb(B, block_b):
    """Batch tile: multiple of 16 (bf16 sublane packing), sized so the ragged
    tail is small, and >= 2 grid steps when B > 32 so both of v7x's
    TensorCores get work (no-op on single-TC v5e/v6e)."""
    n_tiles = _cdiv(B, max(block_b, 16))
    if B > 32:
        n_tiles = max(n_tiles, 2)
    tb = _round_up(_cdiv(B, n_tiles), 16)
    tb = min(tb, _round_up(B, 8))   # never much bigger than the batch itself
    return max(tb, 8)


def ppo_policy_forward(obs, prepped_params, *, block_b=1024):
    """Returns (mean [B, ac_dim] f32, std [1, ac_dim] f32) of the Gaussian
    action distribution. `prepped_params` comes from prepare_params()."""
    w1_p, b1_p, w2_p, b2_p, w3_p, b3_p, std = prepped_params
    B, obs_dim = obs.shape
    ac_dim = w3_p.shape[1]

    TB = _choose_tb(B, block_b)
    grid = (pl.cdiv(B, TB),)

    # Weights/biases pinned to the same block every step -> stay VMEM-resident.
    pinned = lambda arr: pl.BlockSpec(arr.shape, lambda i: (0,) * arr.ndim)

    mean = pl.pallas_call(
        ppo_policy_kernel,
        out_shape=jax.ShapeDtypeStruct((B, ac_dim), jnp.float32),
        grid_spec=pltpu.PrefetchScalarGridSpec(
            num_scalar_prefetch=0,
            grid=grid,  # batch-tiled grid; obs/mean tiles double-buffered
            in_specs=[
                # unpadded obs tile: last block dim == full array dim -> legal
                pl.BlockSpec((TB, obs_dim), lambda i: (i, 0)),
                pinned(w1_p), pinned(b1_p),
                pinned(w2_p), pinned(b2_p),
                pinned(w3_p), pinned(b3_p),
            ],
            # unpadded mean tile: last block dim == full array dim -> legal
            out_specs=pl.BlockSpec((TB, ac_dim), lambda i: (i, 0)),
        ),
        compiler_params=pltpu.CompilerParams(
            # batch axis is independent -> "parallel" (2x on v7x's 2 TCs).
            dimension_semantics=("parallel",),
        ),
    )(obs, w1_p, b1_p, w2_p, b2_p, w3_p, b3_p)

    return mean, std


def ref_policy_forward(obs, params, compute_dtype=jnp.bfloat16):
    """Pure-JAX reference mirroring the kernel's bf16 matmul / f32 accum."""
    w1, b1, w2, b2, w3, b3, log_std = params
    x = obs.astype(compute_dtype)
    h1 = jnp.tanh(jnp.dot(x, w1.astype(compute_dtype),
                          preferred_element_type=jnp.float32) + b1)
    h2 = jnp.tanh(jnp.dot(h1.astype(compute_dtype), w2.astype(compute_dtype),
                          preferred_element_type=jnp.float32) + b2)
    mean = jnp.dot(h2.astype(compute_dtype), w3.astype(compute_dtype),
                   preferred_element_type=jnp.float32) + b3
    std = jnp.exp(log_std.astype(jnp.float32)).reshape(1, -1)
    return mean, std


def init_params(key, obs_dim, hidden, ac_dim):
    """Deterministic synthetic parameter init (nn.Linear shapes, stored
    transposed so the kernel computes x @ W)."""
    k1, k2, k3 = jax.random.split(key, 3)
    scale = 0.1
    w1 = scale * jax.random.normal(k1, (obs_dim, hidden), jnp.float32)
    b1 = jnp.zeros((1, hidden), jnp.float32)
    w2 = scale * jax.random.normal(k2, (hidden, hidden), jnp.float32)
    b2 = jnp.zeros((1, hidden), jnp.float32)
    w3 = scale * jax.random.normal(k3, (hidden, ac_dim), jnp.float32)
    b3 = jnp.zeros((1, ac_dim), jnp.float32)
    log_std = -0.5 * jnp.ones((1, ac_dim), jnp.float32)
    return (w1, b1, w2, b2, w3, b3, log_std)


if __name__ == "__main__":
    obs_dim, hidden, ac_dim = 16, 32, 8
    key = jax.random.PRNGKey(0)
    k_obs1, k_obs2, k_obs3, k_par = jax.random.split(key, 4)
    raw_params = init_params(k_par, obs_dim, hidden, ac_dim)
    # One-time param prep (padding + bf16 cast hoisted out of the forward path).
    prepped = prepare_params(raw_params)

    # Case 1: tiny batch, single grid step.
    B1 = 8
    obs1 = jax.random.normal(k_obs1, (B1, obs_dim), jnp.float32)
    mean1, std1 = ppo_policy_forward(obs1, prepped)
    jax.block_until_ready((mean1, std1))
    ref_mean1, ref_std1 = ref_policy_forward(obs1, raw_params)
    assert mean1.shape == (B1, ac_dim)
    assert jnp.allclose(mean1, ref_mean1, atol=1e-3, rtol=1e-3)
    assert jnp.allclose(std1, ref_std1, atol=1e-6, rtol=1e-6)

    # Case 2: ragged batch + small block -> multi-step grid with partial tail.
    B2 = 20
    obs2 = jax.random.normal(k_obs2, (B2, obs_dim), jnp.float32)
    mean2, std2 = ppo_policy_forward(obs2, prepped, block_b=8)
    jax.block_until_ready((mean2, std2))
    ref_mean2, ref_std2 = ref_policy_forward(obs2, raw_params)
    assert mean2.shape == (B2, ac_dim)
    assert jnp.allclose(mean2, ref_mean2, atol=1e-3, rtol=1e-3)
    assert jnp.allclose(std2, ref_std2, atol=1e-6, rtol=1e-6)

    # Case 3: larger batch -> TB chosen to give >= 2 grid steps (dual-TC path
    # on v7x), ragged tail masked on store.
    B3 = 200
    obs3 = jax.random.normal(k_obs3, (B3, obs_dim), jnp.float32)
    mean3, std3 = ppo_policy_forward(obs3, prepped)
    jax.block_until_ready((mean3, std3))
    ref_mean3, ref_std3 = ref_policy_forward(obs3, raw_params)
    assert mean3.shape == (B3, ac_dim)
    assert jnp.allclose(mean3, ref_mean3, atol=1e-3, rtol=1e-3)
    assert jnp.allclose(std3, ref_std3, atol=1e-6, rtol=1e-6)

    # TODO(synk): PPO.update() (Adam loop, clipped surrogate loss, KL
    # early-stopping, DataLoaders) is training machinery, not the forward
    # pass, and is not kernelized.
    print("KERNEL_OK")
</pallas_src>

<mosaic_0001>
module attributes {stable_mosaic.version = 11 : i64} {
  func.func @ppo_policy_kernel(%arg0: i32, %arg1: memref<8x16xf32, #tpu.memory_space<vmem>>, %arg2: memref<16x128xbf16, #tpu.memory_space<vmem>>, %arg3: memref<1x128xf32, #tpu.memory_space<vmem>>, %arg4: memref<128x128xbf16, #tpu.memory_space<vmem>>, %arg5: memref<1x128xf32, #tpu.memory_space<vmem>>, %arg6: memref<128x8xbf16, #tpu.memory_space<vmem>>, %arg7: memref<1x8xf32, #tpu.memory_space<vmem>>, %arg8: memref<8x8xf32, #tpu.memory_space<vmem>>) attributes {dimension_semantics = [#tpu.dimension_semantics<parallel>], iteration_bounds = array<i64: 1>, scalar_prefetch = 0 : i64, scratch_operands = 0 : i64, tpu.core_type = #tpu.core_type<tc>, window_params = [{transform_indices = @transform_0, window_bounds = array<i64: 8, 16>}, {pipeline_mode = #tpu.pipeline_mode<synchronous>, transform_indices = @transform_1, window_bounds = array<i64: 16, 128>}, {pipeline_mode = #tpu.pipeline_mode<synchronous>, transform_indices = @transform_2, window_bounds = array<i64: 1, 128>}, {pipeline_mode = #tpu.pipeline_mode<synchronous>, transform_indices = @transform_3, window_bounds = array<i64: 128, 128>}, {pipeline_mode = #tpu.pipeline_mode<synchronous>, transform_indices = @transform_4, window_bounds = array<i64: 1, 128>}, {pipeline_mode = #tpu.pipeline_mode<synchronous>, transform_indices = @transform_5, window_bounds = array<i64: 128, 8>}, {pipeline_mode = #tpu.pipeline_mode<synchronous>, transform_indices = @transform_6, window_bounds = array<i64: 1, 8>}, {transform_indices = @transform_7, window_bounds = array<i64: 8, 8>}]} {
    %c0 = arith.constant 0 : index
    %c0_0 = arith.constant 0 : index
    %0 = vector.load %arg1[%c0, %c0_0] : memref<8x16xf32, #tpu.memory_space<vmem>>, vector<8x16xf32>
    %1 = arith.truncf %0 : vector<8x16xf32> to vector<8x16xbf16>
    %c0_1 = arith.constant 0 : index
    %c0_2 = arith.constant 0 : index
    %2 = vector.load %arg2[%c0_1, %c0_2] : memref<16x128xbf16, #tpu.memory_space<vmem>>, vector<16x128xbf16>
    %cst = arith.constant dense<0.000000e+00> : vector<8x128xf32>
    %3 = tpu.matmul %1, %2, %cst {dimension_numbers = #tpu.dot_dimension_numbers<[1], [0], [0], [1], [0, 0, 1, 1], [], []>} : vector<8x16xbf16>, vector<16x128xbf16>, vector<8x128xf32> -> vector<8x128xf32>
    %c0_3 = arith.constant 0 : index
    %c0_4 = arith.constant 0 : index
    %4 = vector.load %arg3[%c0_3, %c0_4] : memref<1x128xf32, #tpu.memory_space<vmem>>, vector<1x128xf32>
    %5 = vector.broadcast %4 : vector<1x128xf32> to vector<8x128xf32>
    %6 = arith.addf %3, %5 : vector<8x128xf32>
    %7 = math.tanh %6 : vector<8x128xf32>
    %8 = arith.truncf %7 : vector<8x128xf32> to vector<8x128xbf16>
    %c0_5 = arith.constant 0 : index
    %c0_6 = arith.constant 0 : index
    %9 = vector.load %arg4[%c0_5, %c0_6] : memref<128x128xbf16, #tpu.memory_space<vmem>>, vector<128x128xbf16>
    %cst_7 = arith.constant dense<0.000000e+00> : vector<8x128xf32>
    %10 = tpu.matmul %8, %9, %cst_7 {dimension_numbers = #tpu.dot_dimension_numbers<[1], [0], [0], [1], [0, 0, 1, 1], [], []>} : vector<8x128xbf16>, vector<128x128xbf16>, vector<8x128xf32> -> vector<8x128xf32>
    %c0_8 = arith.constant 0 : index
    %c0_9 = arith.constant 0 : index
    %11 = vector.load %arg5[%c0_8, %c0_9] : memref<1x128xf32, #tpu.memory_space<vmem>>, vector<1x128xf32>
    %12 = vector.broadcast %11 : vector<1x128xf32> to vector<8x128xf32>
    %13 = arith.addf %10, %12 : vector<8x128xf32>
    %14 = math.tanh %13 : vector<8x128xf32>
    %15 = arith.truncf %14 : vector<8x128xf32> to vector<8x128xbf16>
    %c0_10 = arith.constant 0 : index
    %c0_11 = arith.constant 0 : index
    %16 = vector.load %arg6[%c0_10, %c0_11] : memref<128x8xbf16, #tpu.memory_space<vmem>>, vector<128x8xbf16>
    %cst_12 = arith.constant dense<0.000000e+00> : vector<8x8xf32>
    %17 = tpu.matmul %15, %16, %cst_12 {dimension_numbers = #tpu.dot_dimension_numbers<[1], [0], [0], [1], [0, 0, 1, 1], [], []>} : vector<8x128xbf16>, vector<128x8xbf16>, vector<8x8xf32> -> vector<8x8xf32>
    %c0_13 = arith.constant 0 : index
    %c0_14 = arith.constant 0 : index
    %18 = vector.load %arg7[%c0_13, %c0_14] : memref<1x8xf32, #tpu.memory_space<vmem>>, vector<1x8xf32>
    %19 = vector.broadcast %18 : vector<1x8xf32> to vector<8x8xf32>
    %20 = arith.addf %17, %19 : vector<8x8xf32>
    %c0_15 = arith.constant 0 : index
    %c0_16 = arith.constant 0 : index
    %21 = vector.load %arg8[%c0_15, %c0_16] : memref<8x8xf32, #tpu.memory_space<vmem>>, vector<8x8xf32>
    tpu.vector_store %arg8[%c0_15, %c0_16], %20 {strides = array<i32>} : memref<8x8xf32, #tpu.memory_space<vmem>>, vector<8x8xf32>,
    return
  }
  func.func @transform_0(%arg0: i32) -> (i32, i32) {
    %c0_i32 = arith.constant 0 : i32
    %c0_i32_0 = arith.constant 0 : i32
    return %arg0, %c0_i32 : i32, i32
  }
  func.func @transform_1(%arg0: i32) -> (i32, i32) {
    %c0_i32 = arith.constant 0 : i32
    %c0_i32_0 = arith.constant 0 : i32
    %c0_i32_1 = arith.constant 0 : i32
    return %c0_i32, %c0_i32_0 : i32, i32
  }
  func.func @transform_2(%arg0: i32) -> (i32, i32) {
    %c0_i32 = arith.constant 0 : i32
    %c0_i32_0 = arith.constant 0 : i32
    %c0_i32_1 = arith.constant 0 : i32
    return %c0_i32, %c0_i32_0 : i32, i32
  }
  func.func @transform_3(%arg0: i32) -> (i32, i32) {
    %c0_i32 = arith.constant 0 : i32
    %c0_i32_0 = arith.constant 0 : i32
    %c0_i32_1 = arith.constant 0 : i32
    return %c0_i32, %c0_i32_0 : i32, i32
  }
  func.func @transform_4(%arg0: i32) -> (i32, i32) {
    %c0_i32 = arith.constant 0 : i32
    %c0_i32_0 = arith.constant 0 : i32
    %c0_i32_1 = arith.constant 0 : i32
    return %c0_i32, %c0_i32_0 : i32, i32
  }
  func.func @transform_5(%arg0: i32) -> (i32, i32) {
    %c0_i32 = arith.constant 0 : i32
    %c0_i32_0 = arith.constant 0 : i32
    %c0_i32_1 = arith.constant 0 : i32
    return %c0_i32, %c0_i32_0 : i32, i32
  }
  func.func @transform_6(%arg0: i32) -> (i32, i32) {
    %c0_i32 = arith.constant 0 : i32
    %c0_i32_0 = arith.constant 0 : i32
    %c0_i32_1 = arith.constant 0 : i32
    return %c0_i32, %c0_i32_0 : i32, i32
  }
  func.func @transform_7(%arg0: i32) -> (i32, i32) {
    %c0_i32 = arith.constant 0 : i32
    %c0_i32_0 = arith.constant 0 : i32
    return %arg0, %c0_i32 : i32, i32
  }
}

</mosaic_0001>

<bundles_post_ra>
// kernel: tpu_custom_call.1
= control target key start
LH: loop header
LB: loop body
LE: loop exit
PB: predicated region body
PF: predicated region fallthrough
CT: control target
= control target key end

     0   :  { %12 = vsyncpa [#allocation3], 0  ;;  %s676_s0 = inlined_call_operand.vmem [shape: f32[8,16], index: 0, kind: input, shape index: {}]   ;;  %s677_s1 = inlined_call_operand.hbm [shape: bf16[16,128], index: 1, kind: input, shape index: {}]   ;;  %s678_s2 = inlined_call_operand.vmem [shape: f32[1,128], index: 2, kind: input, shape index: {}]   ;;  %s679_s3 = inlined_call_operand.vmem [shape: bf16[128,128], index: 3, kind: input, shape index: {}]   ;;  %s680_s4 = inlined_call_operand.hbm [shape: f32[1,128], index: 4, kind: input, shape index: {}]   ;;  %s681_s5 = inlined_call_operand.vmem [shape: bf16[128,8], index: 5, kind: input, shape index: {}]   ;;  %s682_s6 = inlined_call_operand.vmem [shape: f32[1,8], index: 6, kind: input, shape index: {}]   ;;  %s683_s7 = inlined_call_operand.hbm [shape: f32[8,8], index: 7, kind: output, shape index: {}]  }
   0x1   :  { %13 = vsyncpa [#allocation6], 0 }
   0x2   :  { %14 = vsyncpa [#allocation4], 0  ;;  %s540_s24 = smov [#allocation2]  }
   0x3   :  { %s22_s25 = sshll.u32 %s540_s24, 4  ;;  %s23_s25 = int_to_ptr.vmem [resolvable:$true] %s22_s25 }
   0x4   :  { %s482_s26 = scalar_lea.vmem %s23_s25, 128  ;;  %p487_p1 = scmp.lt.s32.totalorder %s23_s25, %s23_s25 }
   0x5   :  { %p483_p0 = scmp.ne.s32.totalorder %s23_s25, %s482_s26  ;;  %p488_p2 = scmp.lt.s32.totalorder %s482_s26, %s482_s26 }
   0x7   :  { %p489_p3 = por %p488_p2, %p487_p1 }
   0x9   :  { %p490_p4 = pnand %p489_p3, %p483_p0 }
   0xb   :  { %493 = shalt.err (!%p490_p4)
}
   0xc   :  { %s541_s27 = smov 64   ;;  %s542_s28 = smov 4  }
   0xd   :  { %28 = dma.hbm_to_vmem [thread:$0]  %s677_s1, 128, %s23_s25, [#allocation3], %s541_s27, %s541_s27, %s542_s28  }
   0xe   :  { %s543_s8 = smov [#allocation5]  }
   0xf   :  { %s39_s9 = sshll.u32 %s543_s8, 4  ;;  %s40_s9 = int_to_ptr.vmem [resolvable:$true] %s39_s9 }
  0x10   :  { %s502_s10 = scalar_lea.vmem %s40_s9, 16  ;;  %s506_s11 = scalar_lea.vmem %s40_s9, 32 }
  0x11   :  { %p503_p5 = scmp.ne.s32.totalorder %s40_s9, %s502_s10  ;;  %p507_p6 = scmp.lt.s32.totalorder %s40_s9, %s40_s9 }
  0x12   :  { %p508_p7 = scmp.lt.s32.totalorder %s506_s11, %s502_s10 }
  0x14   :  { %p509_p8 = por %p508_p7, %p507_p6 }
  0x16   :  { %p510_p9 = pnand %p509_p8, %p503_p5 }
  0x18   :  { %513 = shalt.err (!%p510_p9)
}
  0x19   :  { %42 = dma.hbm_to_vmem [thread:$0]  %s680_s4, 16, %s40_s9, [#allocation6]  }
  0x1a   :  { %534 = dma.done.wait [#allocation3], 128  }
  0x1b   :  { %535 = vsyncadd [#allocation3], 4294967168 }
  0x1c   :  { %536 = dma.done.wait [#allocation6], 16  }
  0x1d   :  { %537 = vsyncadd [#allocation6], 4294967280  ;;  %v544_v0 = vmov 0.0   ;;  %vm545_vm0 = vmmov 0   ;;  %v453_v1 = vld [vmem:[#allocation2] sm:$0xff]   ;;  %vm71_vm1 = vcmask 130048  }
  0x1e   :  { %400 = vmatprep.subr.bf16.mxu0 %v544_v0  ;;  %402 = vmatprep.mubr.msk.bf16.mxu0 %vm545_vm0, %v544_v0  ;;  %v54_v2 = vld [vmem:[%s676_s0] sm:$0xff]  ;;  %v454_v4 = vld [vmem:[%s679_s3 + $0x38] sm:$0xff]   ;;  %v455_v5 = vld [vmem:[%s679_s3 + $0x30] sm:$0xff]   ;;  %s546_s21 = smov [#allocation7]   ;;  %vm341_vm2 = vcmask 64512  }
  0x1f   :  { %406 = vmatprep.subr.bf16.mxu1 %v544_v0  ;;  %422 = vmatprep.mubr.msk.bf16.mxu1 %vm545_vm0, %v544_v0  ;;  %v55_v3 = vpack.c.bf16 %v54_v2, %v54_v2  ;;  %v456_v6 = vld [vmem:[%s679_s3 + $0x28] sm:$0xff]   ;;  %v457_v7 = vld [vmem:[%s679_s3 + $0x20] sm:$0xff]   ;;  %v458_v8 = vld [vmem:[%s679_s3 + $0x18] sm:$0xff]   ;;  %s349_s22 = sshll.u32 %s546_s21, 4  ;;  %s350_s22 = int_to_ptr.vmem [resolvable:$true] %s349_s22 }
  0x20   :  { %401 = vmatpush3.bf16.msra.mxu0 %v453_v1  ;;  %407 = vmatpush3.bf16.msra.mxu1 %v454_v4  ;;  %v459_v9 = vld [vmem:[%s679_s3 + $0x10] sm:$0xff]   ;;  %v460_v10 = vld [vmem:[%s679_s3 + $0x8] sm:$0xff]   ;;  %v461_v11 = vld [vmem:[%s679_s3] sm:$0xff]   ;;  %p519_p11 = scmp.lt.s32.totalorder %s350_s22, %s350_s22 }
  0x21   :  { %426 = vmatprep.subr.bf16.mxu0 %v544_v0  ;;  %408 = vmatprep.subr.bf16.mxu1 %v544_v0  ;;  %v462_v12 = vld [vmem:[%s681_s5 + $0x38] sm:$0xff]   ;;  %v463_v13 = vld [vmem:[%s681_s5 + $0x30] sm:$0xff]   ;;  %v464_v14 = vld [vmem:[%s681_s5 + $0x28] sm:$0xff]  }
  0x22   :  { %v359_v15 = vld [vmem:[%s678_s2] ss:$0 sm:$0xff]  ;;  %v466_v24 = vld [vmem:[%s681_s5 + $0x18] sm:$0xff]   ;;  %v467_v25 = vld [vmem:[%s681_s5 + $0x10] sm:$0xff]  }
  0x23   :  { %403 = vmatmul.mubr.msk.bf16.vlgmr.msra.gmra.mxu0 %vm71_vm1, %v55_v3  ;;  %v465_v23 = vld [vmem:[%s681_s5 + $0x20] sm:$0xff]   ;;  %v468_v26 = vld [vmem:[%s681_s5 + $0x8] sm:$0xff]  }
  0x24   :  { %442 = vmatprep.mubr.msk.bf16.mxu0 %vm545_vm0, %v544_v0  ;;  %409 = vmatpush3.bf16.msra.mxu1 %v455_v5  ;;  %v469_v27 = vld [vmem:[%s681_s5] sm:$0xff]   ;;  %v362_v28 = vld [vmem:[#allocation5] ss:$0 sm:$0xff]  ;;  %s514_s5 = scalar_lea.vmem %s350_s22, 128 }
  0x25   :  { %410 = vmatprep.subr.bf16.mxu1 %v544_v0  ;;  %427 = vmatpush3.bf16.msra.mxu0 %v462_v12  ;;  %v371_v36 = vld [vmem:[%s682_s6] ss:$0 sm:$0xff]  ;;  %p515_p10 = scmp.ne.s32.totalorder %s350_s22, %s514_s5  ;;  %p520_p12 = scmp.lt.s32.totalorder %s514_s5, %s514_s5 }
  0x26   :  { %428 = vmatprep.subr.bf16.mxu0 %v544_v0 }
  0x27   :  { %p521_p13 = por %p520_p12, %p519_p11 }
  0x28   :  { %411 = vmatpush3.bf16.msra.mxu1 %v456_v6 }
  0x29   :  { %412 = vmatprep.subr.bf16.mxu1 %v544_v0  ;;  %429 = vmatpush3.bf16.msra.mxu0 %v463_v13  ;;  %p522_p0 = pnand %p521_p13, %p515_p10 }
  0x2a   :  { %430 = vmatprep.subr.bf16.mxu0 %v544_v0 }
  0x2c   :  { %413 = vmatpush3.bf16.msra.mxu1 %v457_v7 }
  0x2d   :  { %414 = vmatprep.subr.bf16.mxu1 %v544_v0  ;;  %431 = vmatpush3.bf16.msra.mxu0 %v464_v14 }
  0x2e   :  { %432 = vmatprep.subr.bf16.mxu0 %v544_v0 }
  0x30   :  { %415 = vmatpush3.bf16.msra.mxu1 %v458_v8 }
  0x31   :  { %416 = vmatprep.subr.bf16.mxu1 %v544_v0  ;;  %433 = vmatpush3.bf16.msra.mxu0 %v465_v23 }
  0x32   :  { %434 = vmatprep.subr.bf16.mxu0 %v544_v0 }
  0x34   :  { %417 = vmatpush3.bf16.msra.mxu1 %v459_v9 }
  0x35   :  { %418 = vmatprep.subr.bf16.mxu1 %v544_v0  ;;  %435 = vmatpush3.bf16.msra.mxu0 %v466_v24 }
  0x36   :  { %436 = vmatprep.subr.bf16.mxu0 %v544_v0 }
  0x38   :  { %419 = vmatpush3.bf16.msra.mxu1 %v460_v10 }
  0x39   :  { %420 = vmatprep.subr.bf16.mxu1 %v544_v0  ;;  %437 = vmatpush3.bf16.msra.mxu0 %v467_v25 }
  0x3a   :  { %438 = vmatprep.subr.bf16.mxu0 %v544_v0 }
  0x3c   :  { %421 = vmatpush3.bf16.msra.mxu1 %v461_v11 }
  0x3d   :  { %439 = vmatpush3.bf16.msra.mxu0 %v468_v26 }
  0x3e   :  { %440 = vmatprep.subr.bf16.mxu0 %v544_v0 }
  0x41   :  { %441 = vmatpush3.bf16.msra.mxu0 %v469_v27 }
  0xe3   :  { %v109_v16 = vpop.f32.mrf.mxu0 }
  0xe4   :  { %v110_v17 = vadd.f32 %v359_v15, %v109_v16 }
  0xe5   :  { %v404_v18 = vpop.f32.mrf.mxu0 }
  0xe6   :  { %470 = vtanh.f32 %v110_v17 }
  0xe7   :  { %v112_v19 = vpop.f32.mrf.mxu0 }
  0xe9   :  { %v405_v20 = vpop.f32.mrf.mxu0 }
  0xf3   :  { %v471_v21 = vpop.eup %470 }
  0xf4   :  { %v116_v22 = vpack.c.bf16 %v471_v21, %v471_v21 }
  0xf6   :  { %423 = vmatmul.mubr.bf16.vlgmr.msra.gmra.mxu1 %v116_v22 }
 0x1b6   :  { %v222_v29 = vpop.f32.mrf.mxu1 }
 0x1b7   :  { %v223_v30 = vadd.f32 %v362_v28, %v222_v29 }
 0x1b8   :  { %v424_v31 = vpop.f32.mrf.mxu1 }
 0x1b9   :  { %472 = vtanh.f32 %v223_v30 }
 0x1ba   :  { %v225_v32 = vpop.f32.mrf.mxu1 }
 0x1bc   :  { %v425_v33 = vpop.f32.mrf.mxu1 }
 0x1c6   :  { %v473_v34 = vpop.eup %472 }
 0x1c7   :  { %v229_v35 = vpack.c.bf16 %v473_v34, %v473_v34 }
 0x1c9   :  { %443 = vmatmul.mubr.bf16.vlgmr.msra.gmra.mxu0 %v229_v35 }
 0x289   :  { %v335_v37 = vpop.f32.mrf.mxu0 }
 0x28a   :  { %v336_v38 = vadd.f32 %v371_v36, %v335_v37 }
 0x28b   :  { %v444_v39 = vpop.f32.mrf.mxu0 }
 0x28c   :  { %342 = vst.msk [vmem:[#allocation7] sm:$0xff] %vm341_vm2, %v336_v38 }
 0x28d   :  { %v338_v40 = vpop.f32.mrf.mxu0 }
 0x28e   :  { %525 = shalt.err (!%p522_p0)
}
 0x28f   :  { %352 = dma.vmem_to_hbm [thread:$0]  %s350_s22, 128, %s683_s7, [#allocation4]   ;;  %v445_v41 = vpop.f32.mrf.mxu0 }
 0x290   :  { %538 = dma.done.wait [#allocation4], 128  }
 0x291   :  { %539 = vsyncadd [#allocation4], 4294967168 }
 0x292   :  { %356 = vsyncpa [#allocation3], 1 }
 0x293   :  { %357 = vsyncpa [#allocation6], 1 }
 0x294   :  { %358 = vsyncpa [#allocation4], 1 }

</bundles_post_ra>
